<compile_context>
chip_gen: v5e
topology: v5e:2x2
jax: 0.10.0
libtpu: 0.0.40
codegen_flags: <defaults>
</compile_context>

<pallas_src>
import math

import numpy as np
import jax
import jax.numpy as jnp
from jax import lax
from jax.experimental import pallas as pl
from jax.experimental.pallas import tpu as pltpu


def _round_up(v, m):
    return ((v + m - 1) // m) * m


def _make_ef_const(d):
    """(3d, 2*d*d) bf16 0/1 matrix.

    With rows = [x_hi | x_mid | x_lo], rows @ EF = [a | b] where
      a[r, i*d + j] = x[r, i]   and   b[r, i*d + j] = x[r, j],
    each reconstructed exactly (the MXU accumulates the 3 bf16 components in
    f32; since EF entries are 0/1 every product is exact).
    """
    dd = d * d
    k = np.arange(d)[:, None]
    c = np.arange(dd)[None, :]
    e = (c // d == k).astype(np.float32)   # selects x[:, i]
    f = (c % d == k).astype(np.float32)    # selects x[:, j]
    ef = np.concatenate([e, f], axis=1)    # (d, 2*dd)
    return jnp.asarray(np.tile(ef, (3, 1)), dtype=jnp.bfloat16)


def _split_bf16x3(x):
    """Exact 3-way bf16 split: hi + mid + lo == x for every f32 x (24 bits)."""
    hi = x.astype(jnp.bfloat16)
    r1 = x - hi.astype(jnp.float32)
    mid = r1.astype(jnp.bfloat16)
    lo = (r1 - mid.astype(jnp.float32)).astype(jnp.bfloat16)
    return jnp.concatenate([hi, mid, lo], axis=-1)   # (..., 3d) bf16


# ----------------------------------------------------------------------------
# Kernel: lane-dense second-order max pooling
#   out[r, i*D + j] = max_n x[r, n, i] * x[r, n, j]
# ----------------------------------------------------------------------------
def _make_pool_kernel(d, n_sub, fuse_l2norm):
    dd = d * d

    def kernel(x_ref, ef_ref, o_ref, acc_ref):
        k = pl.program_id(2)                       # N-chunk (reduction) index

        @pl.when(k == 0)
        def _init():
            acc_ref[...] = jnp.full(acc_ref.shape, -jnp.inf, acc_ref.dtype)

        ef = ef_ref[...]                           # (3d, 2*dd) bf16, loaded once
        tb = acc_ref.shape[0]

        def body(c, carry):
            start = pl.multiple_of(c * 8, 8)
            xs = x_ref[:, pl.ds(start, 8), :]      # (tb, 8, 3d) bf16
            rows = xs.reshape(tb * 8, 3 * d)
            # Single default-precision bf16 MXU pass; exact f32 reconstruction.
            y = jnp.dot(rows, ef, preferred_element_type=jnp.float32)
            v = y[:, :dd] * y[:, dd:]              # (tb*8, dd) f32 outer products
            # Elementwise max into 8 per-(b,t) partial slots: no cross-sublane
            # reduction in the hot loop.
            return jnp.maximum(carry, v.reshape(tb, 8, dd))

        part = lax.fori_loop(0, n_sub, body, acc_ref[...], unroll=4)
        acc_ref[...] = part

        @pl.when(k == pl.num_programs(2) - 1)
        def _finalize():
            out = jnp.max(part, axis=1)            # (tb, dd): one sublane reduce
            if fuse_l2norm:
                # F.normalize(p=2, dim=-1, eps=1e-12)
                ssq = jnp.sum(out * out, axis=-1, keepdims=True)
                out = out * lax.rsqrt(jnp.maximum(ssq, 1e-24))
            o_ref[...] = out

    return kernel


def _max_outer_pool(x_flat, *, tile_bt=8, tile_n=512, fuse_l2norm=False):
    """x_flat: (BT, N, D) f32 -> (BT, D*D) f32, out[r, i*D+j] = max_n x_i*x_j."""
    bt, n, d = x_flat.shape
    dd = d * d

    tb = min(tile_bt, bt)
    tn = max(32, min(_round_up(tile_n, 32), _round_up(n, 32)))
    bt_pad = _round_up(bt, tb)
    bt_blocks = bt_pad // tb
    n_pad = _round_up(n, tn)
    chunks = n_pad // tn

    # v7x megacore: if the (b,t) axis gives < 2 parallel blocks, split the N
    # reduction into two parallel halves (combined with a max outside).
    split = 2 if (bt_blocks < 2 and chunks >= 2 and not fuse_l2norm) else 1
    if chunks % split:
        chunks += 1
        n_pad += tn
    kps = chunks // split

    if bt_pad != bt or n_pad != n:
        # Edge padding duplicates real rows, which never changes a max, so no
        # in-kernel masking is needed for the padded tails.
        x_flat = jnp.pad(x_flat, ((0, bt_pad - bt), (0, n_pad - n), (0, 0)),
                         mode="edge")

    x48 = _split_bf16x3(x_flat)                    # (bt_pad, n_pad, 3d) bf16
    ef = _make_ef_const(d)                         # (3d, 2*dd) bf16 constant

    n_sub = tn // 8
    kernel = _make_pool_kernel(d, n_sub, fuse_l2norm)

    flops = 2 * bt_pad * n_pad * (3 * d) * (2 * dd) + 2 * bt_pad * n_pad * dd
    bytes_accessed = int(x48.size) * 2 + int(ef.size) * 2 + split * bt_pad * dd * 4

    out = pl.pallas_call(
        kernel,
        grid=(split, bt_blocks, kps),
        in_specs=[
            pl.BlockSpec((tb, tn, 3 * d), lambda s, i, k: (i, s * kps + k, 0)),
            pl.BlockSpec((3 * d, 2 * dd), lambda s, i, k: (0, 0)),
        ],
        out_specs=pl.BlockSpec((None, tb, dd), lambda s, i, k: (s, i, 0)),
        out_shape=jax.ShapeDtypeStruct((split, bt_pad, dd), jnp.float32),
        scratch_shapes=[pltpu.VMEM((tb, 8, dd), jnp.float32)],
        compiler_params=pltpu.CompilerParams(
            dimension_semantics=("parallel", "parallel", "arbitrary")),
        cost_estimate=pl.CostEstimate(flops=flops, transcendentals=0,
                                      bytes_accessed=bytes_accessed),
    )(x48, ef)

    out = jnp.max(out, axis=0)                     # combine split halves
    return out[:bt]


# ----------------------------------------------------------------------------
# SOP forward (module defaults: is_vec=True, do_pe=True, do_fc=False)
# ----------------------------------------------------------------------------
def sop_forward(x, *, is_vec=True, do_pe=True, tile_n=512):
    x = jnp.asarray(x, jnp.float32)
    while x.ndim < 4:
        x = x[None]
    B, T, N, D = x.shape
    fuse_norm = is_vec and not do_pe

    pooled = _max_outer_pool(x.reshape(B * T, N, D), tile_n=tile_n,
                             fuse_l2norm=fuse_norm)           # (B*T, D*D)

    if do_pe:
        # The max-pooled Gram is exactly symmetric, so the reference's
        # U*sqrt(S)*V^T (torch.svd) equals Q*sign(lam)*sqrt(|lam|)*Q^T from
        # eigh, which is far cheaper than batched SVD on TPU.
        # TODO(synk): the PyTorch reference runs this step in float64; TPU has
        # no native f64, so it runs in f32 here.
        g = pooled.reshape(B * T, D, D)
        lam, q = jnp.linalg.eigh(g)
        s_alpha = jnp.sign(lam) * jnp.sqrt(jnp.abs(lam))
        g = jnp.einsum("bij,bj,bkj->bik", q, s_alpha, q)
        pooled = g.reshape(B * T, D * D)

    y = pooled.reshape(B, T, D * D) if is_vec else pooled.reshape(B, T, D, D)

    if not fuse_norm:
        # F.normalize(p=2, dim=-1, eps=1e-12); XLA fuses it with the eigh
        # recomposition, a separate pallas_call would cost more than the work.
        ssq = jnp.sum(y * y, axis=-1, keepdims=True)
        y = y * lax.rsqrt(jnp.maximum(ssq, 1e-24))

    return jnp.squeeze(y)      # torch.squeeze drops all size-1 dims; same here.


if __name__ == "__main__":
    B, T, N, D = 2, 2, 40, 16            # input_dim = 16  -> sop_dim = 256
    key = jax.random.PRNGKey(0)
    x = jax.random.normal(key, (B, T, N, D), dtype=jnp.float32)

    # fc1/fc2 parameters from __init__ (cs = [256, 128, 64]); UNUSED in forward
    # because do_fc=False - kept only to mirror the reference module state.
    sop_dim = D * D
    cs = [sop_dim, sop_dim // 2, sop_dim // 4]
    k1, k2, k3, k4 = jax.random.split(jax.random.PRNGKey(1), 4)
    lim0, lim1 = 1 / math.sqrt(cs[0]), 1 / math.sqrt(cs[1])
    fc1_w = jax.random.uniform(k1, (cs[1], cs[0]), jnp.float32, -lim0, lim0)
    fc1_b = jax.random.uniform(k2, (cs[1],), jnp.float32, -lim0, lim0)
    fc2_w = jax.random.uniform(k3, (cs[2], cs[1]), jnp.float32, -lim1, lim1)
    fc2_b = jax.random.uniform(k4, (cs[2],), jnp.float32, -lim1, lim1)
    _ = (fc1_w, fc1_b, fc2_w, fc2_b)

    # Sanity check of the Pallas pooling kernel against plain jnp. tile_n=32
    # exercises the chunked-N path, the 2-way parallel N split, the exact
    # bf16x3 MXU expansion and BT / N edge padding.
    xf = x.reshape(B * T, N, D)
    pooled = _max_outer_pool(xf, tile_n=32)
    ref = jnp.max(xf[:, :, :, None] * xf[:, :, None, :], axis=1)
    ref = ref.reshape(B * T, D * D)
    assert jnp.allclose(pooled, ref, rtol=1e-5, atol=1e-6), \
        float(jnp.max(jnp.abs(pooled - ref)))

    out = jax.jit(sop_forward)(x)
    jax.block_until_ready(out)
    assert out.shape == (B, T, D * D), out.shape
    assert bool(jnp.all(jnp.isfinite(out)))
    print("KERNEL_OK")
</pallas_src>

<mosaic_0001>
module attributes {stable_mosaic.version = 11 : i64} {
  func.func @kernel(%arg0: i32, %arg1: i32, %arg2: i32, %arg3: memref<4x32x48xbf16, #tpu.memory_space<vmem>>, %arg4: memref<48x512xbf16, #tpu.memory_space<vmem>>, %arg5: memref<1x4x256xf32, #tpu.memory_space<vmem>>, %arg6: memref<4x8x256xf32, #tpu.memory_space<vmem>>) attributes {dimension_semantics = [#tpu.dimension_semantics<parallel>, #tpu.dimension_semantics<parallel>, #tpu.dimension_semantics<arbitrary>], iteration_bounds = array<i64: 2, 1, 1>, scalar_prefetch = 0 : i64, scratch_operands = 1 : i64, tpu.core_type = #tpu.core_type<tc>, window_params = [{transform_indices = @transform_0, window_bounds = array<i64: 4, 32, 48>}, {pipeline_mode = #tpu.pipeline_mode<synchronous>, transform_indices = @transform_1, window_bounds = array<i64: 48, 512>}, {transform_indices = @transform_2, window_bounds = array<i64: 1, 4, 256>}]} {
    %c0_i32 = arith.constant 0 : i32
    %0 = arith.cmpi eq, %arg2, %c0_i32 : i32
    %1 = arith.extui %0 : i1 to i32
    %c0_i32_0 = arith.constant 0 : i32
    %2 = arith.cmpi ne, %1, %c0_i32_0 : i32
    scf.if %2 {
      %cst_25 = arith.constant 0xFF800000 : f32
      %53 = vector.broadcast %cst_25 : f32 to vector<4x8x256xf32>
      %c0_26 = arith.constant 0 : index
      %c0_27 = arith.constant 0 : index
      %c0_28 = arith.constant 0 : index
      %54 = vector.load %arg6[%c0_26, %c0_27, %c0_28] : memref<4x8x256xf32, #tpu.memory_space<vmem>>, vector<4x8x256xf32>
      tpu.vector_store %arg6[%c0_26, %c0_27, %c0_28], %53 {strides = array<i32>} : memref<4x8x256xf32, #tpu.memory_space<vmem>>, vector<4x8x256xf32>,
    } else {
    }
    %c0 = arith.constant 0 : index
    %c0_1 = arith.constant 0 : index
    %3 = vector.load %arg4[%c0, %c0_1] : memref<48x512xbf16, #tpu.memory_space<vmem>>, vector<48x512xbf16>
    %c0_2 = arith.constant 0 : index
    %c0_3 = arith.constant 0 : index
    %c0_4 = arith.constant 0 : index
    %4 = vector.load %arg6[%c0_2, %c0_3, %c0_4] : memref<4x8x256xf32, #tpu.memory_space<vmem>>, vector<4x8x256xf32>
    %c0_i32_5 = arith.constant 0 : i32
    %c8_i32 = arith.constant 8 : i32
    %5 = arith.muli %c0_i32_5, %c8_i32 : i32
    %6 = tpu.assume_multiple %5, 8 : i32
    %c0_6 = arith.constant 0 : index
    %7 = arith.index_cast %6 : i32 to index
    %c0_7 = arith.constant 0 : index
    %8 = vector.load %arg3[%c0_6, %7, %c0_7] : memref<4x32x48xbf16, #tpu.memory_space<vmem>>, vector<4x8x48xbf16>
    %9 = vector.shape_cast %8 : vector<4x8x48xbf16> to vector<32x48xbf16>
    %cst = arith.constant dense<0.000000e+00> : vector<32x512xf32>
    %10 = tpu.matmul %9, %3, %cst {dimension_numbers = #tpu.dot_dimension_numbers<[1], [0], [0], [1], [0, 0, 1, 1], [], []>} : vector<32x48xbf16>, vector<48x512xbf16>, vector<32x512xf32> -> vector<32x512xf32>
    %11 = vector.extract_strided_slice %10 {offsets = [0, 0], sizes = [32, 256], strides = [1, 1]} : vector<32x512xf32> to vector<32x256xf32>
    %12 = vector.extract_strided_slice %10 {offsets = [0, 256], sizes = [32, 256], strides = [1, 1]} : vector<32x512xf32> to vector<32x256xf32>
    %13 = arith.mulf %11, %12 : vector<32x256xf32>
    %14 = vector.shape_cast %13 : vector<32x256xf32> to vector<4x8x256xf32>
    %15 = arith.maximumf %4, %14 : vector<4x8x256xf32>
    %c1_i32 = arith.constant 1 : i32
    %c8_i32_8 = arith.constant 8 : i32
    %16 = arith.muli %c1_i32, %c8_i32_8 : i32
    %17 = tpu.assume_multiple %16, 8 : i32
    %c0_9 = arith.constant 0 : index
    %18 = arith.index_cast %17 : i32 to index
    %c0_10 = arith.constant 0 : index
    %19 = vector.load %arg3[%c0_9, %18, %c0_10] : memref<4x32x48xbf16, #tpu.memory_space<vmem>>, vector<4x8x48xbf16>
    %20 = vector.shape_cast %19 : vector<4x8x48xbf16> to vector<32x48xbf16>
    %cst_11 = arith.constant dense<0.000000e+00> : vector<32x512xf32>
    %21 = tpu.matmul %20, %3, %cst_11 {dimension_numbers = #tpu.dot_dimension_numbers<[1], [0], [0], [1], [0, 0, 1, 1], [], []>} : vector<32x48xbf16>, vector<48x512xbf16>, vector<32x512xf32> -> vector<32x512xf32>
    %22 = vector.extract_strided_slice %21 {offsets = [0, 0], sizes = [32, 256], strides = [1, 1]} : vector<32x512xf32> to vector<32x256xf32>
    %23 = vector.extract_strided_slice %21 {offsets = [0, 256], sizes = [32, 256], strides = [1, 1]} : vector<32x512xf32> to vector<32x256xf32>
    %24 = arith.mulf %22, %23 : vector<32x256xf32>
    %25 = vector.shape_cast %24 : vector<32x256xf32> to vector<4x8x256xf32>
    %26 = arith.maximumf %15, %25 : vector<4x8x256xf32>
    %c2_i32 = arith.constant 2 : i32
    %c8_i32_12 = arith.constant 8 : i32
    %27 = arith.muli %c2_i32, %c8_i32_12 : i32
    %28 = tpu.assume_multiple %27, 8 : i32
    %c0_13 = arith.constant 0 : index
    %29 = arith.index_cast %28 : i32 to index
    %c0_14 = arith.constant 0 : index
    %30 = vector.load %arg3[%c0_13, %29, %c0_14] : memref<4x32x48xbf16, #tpu.memory_space<vmem>>, vector<4x8x48xbf16>
    %31 = vector.shape_cast %30 : vector<4x8x48xbf16> to vector<32x48xbf16>
    %cst_15 = arith.constant dense<0.000000e+00> : vector<32x512xf32>
    %32 = tpu.matmul %31, %3, %cst_15 {dimension_numbers = #tpu.dot_dimension_numbers<[1], [0], [0], [1], [0, 0, 1, 1], [], []>} : vector<32x48xbf16>, vector<48x512xbf16>, vector<32x512xf32> -> vector<32x512xf32>
    %33 = vector.extract_strided_slice %32 {offsets = [0, 0], sizes = [32, 256], strides = [1, 1]} : vector<32x512xf32> to vector<32x256xf32>
    %34 = vector.extract_strided_slice %32 {offsets = [0, 256], sizes = [32, 256], strides = [1, 1]} : vector<32x512xf32> to vector<32x256xf32>
    %35 = arith.mulf %33, %34 : vector<32x256xf32>
    %36 = vector.shape_cast %35 : vector<32x256xf32> to vector<4x8x256xf32>
    %37 = arith.maximumf %26, %36 : vector<4x8x256xf32>
    %c3_i32 = arith.constant 3 : i32
    %c8_i32_16 = arith.constant 8 : i32
    %38 = arith.muli %c3_i32, %c8_i32_16 : i32
    %39 = tpu.assume_multiple %38, 8 : i32
    %c0_17 = arith.constant 0 : index
    %40 = arith.index_cast %39 : i32 to index
    %c0_18 = arith.constant 0 : index
    %41 = vector.load %arg3[%c0_17, %40, %c0_18] : memref<4x32x48xbf16, #tpu.memory_space<vmem>>, vector<4x8x48xbf16>
    %42 = vector.shape_cast %41 : vector<4x8x48xbf16> to vector<32x48xbf16>
    %cst_19 = arith.constant dense<0.000000e+00> : vector<32x512xf32>
    %43 = tpu.matmul %42, %3, %cst_19 {dimension_numbers = #tpu.dot_dimension_numbers<[1], [0], [0], [1], [0, 0, 1, 1], [], []>} : vector<32x48xbf16>, vector<48x512xbf16>, vector<32x512xf32> -> vector<32x512xf32>
    %44 = vector.extract_strided_slice %43 {offsets = [0, 0], sizes = [32, 256], strides = [1, 1]} : vector<32x512xf32> to vector<32x256xf32>
    %45 = vector.extract_strided_slice %43 {offsets = [0, 256], sizes = [32, 256], strides = [1, 1]} : vector<32x512xf32> to vector<32x256xf32>
    %46 = arith.mulf %44, %45 : vector<32x256xf32>
    %47 = vector.shape_cast %46 : vector<32x256xf32> to vector<4x8x256xf32>
    %48 = arith.maximumf %37, %47 : vector<4x8x256xf32>
    %c4_i32 = arith.constant 4 : i32
    %c0_20 = arith.constant 0 : index
    %c0_21 = arith.constant 0 : index
    %c0_22 = arith.constant 0 : index
    %49 = vector.load %arg6[%c0_20, %c0_21, %c0_22] : memref<4x8x256xf32, #tpu.memory_space<vmem>>, vector<4x8x256xf32>
    tpu.vector_store %arg6[%c0_20, %c0_21, %c0_22], %48 {strides = array<i32>} : memref<4x8x256xf32, #tpu.memory_space<vmem>>, vector<4x8x256xf32>,
    %c0_i32_23 = arith.constant 0 : i32
    %50 = arith.cmpi eq, %arg2, %c0_i32_23 : i32
    %51 = arith.extui %50 : i1 to i32
    %c0_i32_24 = arith.constant 0 : i32
    %52 = arith.cmpi ne, %51, %c0_i32_24 : i32
    scf.if %52 {
      %cst_25 = arith.constant dense<0xFF800000> : vector<4x256xf32>
      %53 = vector.multi_reduction <maximumf>, %48, %cst_25 [1] : vector<4x8x256xf32> to vector<4x256xf32>
      %c0_26 = arith.constant 0 : index
      %c0_27 = arith.constant 0 : index
      %c0_28 = arith.constant 0 : index
      %54 = vector.load %arg5[%c0_26, %c0_27, %c0_28] : memref<1x4x256xf32, #tpu.memory_space<vmem>>, vector<1x4x256xf32>
      %55 = vector.shape_cast %54 : vector<1x4x256xf32> to vector<4x256xf32>
      %56 = vector.shape_cast %53 : vector<4x256xf32> to vector<1x4x256xf32>
      tpu.vector_store %arg5[%c0_26, %c0_27, %c0_28], %56 {strides = array<i32>} : memref<1x4x256xf32, #tpu.memory_space<vmem>>, vector<1x4x256xf32>,
    } else {
    }
    return
  }
  func.func @transform_0(%arg0: i32, %arg1: i32, %arg2: i32) -> (i32, i32, i32) {
    %c1_i32 = arith.constant 1 : i32
    %0 = arith.muli %arg0, %c1_i32 : i32
    %1 = arith.addi %0, %arg2 : i32
    %c0_i32 = arith.constant 0 : i32
    %c0_i32_0 = arith.constant 0 : i32
    return %arg1, %1, %c0_i32 : i32, i32, i32
  }
  func.func @transform_1(%arg0: i32, %arg1: i32, %arg2: i32) -> (i32, i32) {
    %c0_i32 = arith.constant 0 : i32
    %c0_i32_0 = arith.constant 0 : i32
    %c0_i32_1 = arith.constant 0 : i32
    return %c0_i32, %c0_i32_0 : i32, i32
  }
  func.func @transform_2(%arg0: i32, %arg1: i32, %arg2: i32) -> (i32, i32, i32) {
    %c0_i32 = arith.constant 0 : i32
    %c0_i32_0 = arith.constant 0 : i32
    return %arg0, %arg1, %c0_i32 : i32, i32, i32
  }
}

</mosaic_0001>

<bundles_post_ra>
// kernel: tpu_custom_call.1
= control target key start
LH: loop header
LB: loop body
LE: loop exit
PB: predicated region body
PF: predicated region fallthrough
CT: control target
= control target key end

     0   :  { %7 = vsyncpa [#allocation5], 0  ;;  %s1691_s0 = inlined_call_operand.vmem [shape: bf16[4,64,48], index: 0, kind: input, shape index: {}]   ;;  %s1692_s1 = inlined_call_operand.vmem [shape: bf16[48,512], index: 1, kind: input, shape index: {}]   ;;  %s1693_s2 = inlined_call_operand.hbm [shape: f32[2,4,256], index: 2, kind: output, shape index: {}]  }
   0x1   :  { %9 = vsyncpa [#allocation5 + $0x1], 0  ;;  %s1329_s9 = smov 0   ;;  %s1331_s10 = smov 0  }
   0x2   :  { %s1333_s11 = smov 0   ;;  %s1335_s12 = smov 0  }
   0x3   :  { %s1337_s13 = smov 0   ;;  %s1339_s14 = smov 0  }
   0x4 LB: > { %s1018_s15 = sadd.s32 4294967295, %s1312_s14   ;;  %s1019_s16 = sadd.s32 4294967294, %s1312_s14   ;;  %s1312_s14 = sphi %s1339_s14, %s15_s14   ;;  %s1308_s13 = sphi %s1337_s13, %s1700_s13   ;;  %s1304_s12 = sphi %s1335_s12, %s1699_s12   ;;  %s1300_s11 = sphi %s1333_s11, %s1698_s11   ;;  %s1296_s10 = sphi %s1331_s10, %s1697_s10   ;;  %s1292_s9 = sphi %s1329_s9, %s1696_s9  }
   0x5   : > { %s34_s17 = sadd.s32 1, %s1308_s13  ;;  %s45_s18 = sadd.s32 1, %s1300_s11 }
   0x6   : > { %p36_p0 = scmp.ge.s32.totalorder %s34_s17, 2  ;;  %p52_p1 = scmp.ne.s32.totalorder %s1300_s11, %s1296_s10 }
   0x7   : > { %p53_p2 = scmp.eq.s32.totalorder %s1312_s14, 0  ;;  %p105_p3 = scmp.eq.s32.totalorder %s1018_s15, 1 }
   0x8   : > { %s1702_s17 = smov (%p36_p0, %s34_s17), 0  ;;  %p110_p6 = scmp.ne.s32.totalorder %s1296_s10, %s1292_s9 }
   0x9   : > { %p54_p4 = por %p53_p2, %p52_p1  ;;  %p1368_p5 = por %p105_p3, %p52_p1 }
   0xa   : > { %s41_s20 = ssub.s32 %s1308_s13, %s1702_s17  ;;  %p111_p8 = scmp.eq.s32.totalorder %s1019_s16, 1 }
   0xb   : > { %p43_p7 = scmp.eq.s32.totalorder %s41_s20, 0  ;;  %p1021_p10 = scmp.ge.s32.totalorder %s1312_s14, 2 }
   0xc   : > { %p1379_p9 = por %p111_p8, %p110_p6 }
   0xd   : > { %s1377_s21 = scalar_select %p43_p7, %s1300_s11, %s45_s18  }
   0xe   : > { %130 = sbr.rel (%p1021_p10) target bundleno = 31 (0x1f), region = 20 }
  0x13   : > { %133 = sbr.rel (!%p54_p4) target bundleno = 31 (0x1f), region = 24  ;;  %s135_s23 = sand.u32 (%p54_p4), 1, %s1300_s11  }
  0x14   : > { %s1157_s24 = sshll.u32 (%p54_p4), %s1308_s13, 4  ;;  %s1022_s25 = sshll.u32 (%p54_p4), %s135_s23, 6 }
  0x15   : > { %s144_s28 = scalar_lea.vmem (%p54_p4), %s1691_s0, %s1157_s24  ;;  %s137_s29 = scalar_lea.vmem (%p54_p4), [#allocation3], %s1022_s25 }
  0x16   : > { %v161_v0 = vld [vmem:[%s144_s28] sm:$0xff] (%p54_p4)   ;;  %v165_v1 = vld [vmem:[%s144_s28 + $0x8] sm:$0xff] (%p54_p4)  }
  0x17   : > { %v169_v2 = vld [vmem:[%s144_s28 + $0x20] sm:$0xff] (%p54_p4)   ;;  %162 = vst [vmem:[%s137_s29] sm:$0xff] (%p54_p4), %v161_v0   ;;  %v173_v3 = vld [vmem:[%s144_s28 + $0x28] sm:$0xff] (%p54_p4)  }
  0x18   : > { %166 = vst [vmem:[%s137_s29 + $0x8] sm:$0xff] %v165_v1   ;;  %v177_v4 = vld [vmem:[%s144_s28 + $0x40] sm:$0xff]   ;;  %v181_v5 = vld [vmem:[%s144_s28 + $0x48] sm:$0xff]  }
  0x19   : > { %170 = vst [vmem:[%s137_s29 + $0x10] sm:$0xff] %v169_v2   ;;  %v185_v6 = vld [vmem:[%s144_s28 + $0x60] sm:$0xff]   ;;  %v189_v7 = vld [vmem:[%s144_s28 + $0x68] sm:$0xff]  }
  0x1a   : > { %174 = vst [vmem:[%s137_s29 + $0x18] sm:$0xff] %v173_v3  }
  0x1b   : > { %178 = vst [vmem:[%s137_s29 + $0x20] sm:$0xff] %v177_v4  }
  0x1c   : > { %182 = vst [vmem:[%s137_s29 + $0x28] sm:$0xff] %v181_v5  }
  0x1d   : > { %186 = vst [vmem:[%s137_s29 + $0x30] sm:$0xff] %v185_v6  }
  0x1e   : > { %190 = vst [vmem:[%s137_s29 + $0x38] sm:$0xff] %v189_v7  }
  0x1f PF: > { %p1025_p11 = scmp.ge.s32.totalorder %s1312_s14, 1  ;;  %p247_p12 = scmp.lt.s32.totalorder %s1312_s14, 3 }
  0x21   : > { %p248_p13 = pnand %p1025_p11, %p247_p12 }
  0x22   : > { %s1495_s24 = sand.u32 (!%p248_p13), 1, %s1296_s10   ;;  %s1178_s28 = sshll.u32 (!%p248_p13), %s1304_s12, 3 }
  0x23   : > { %251 = sbr.rel (%p248_p13) target bundleno = 334 (0x14e), region = 65  ;;  %s1026_s25 = sshll.u32 (!%p248_p13), %s1495_s24, 6 }
  0x24   : > { %s1502_s26 = scalar_lea.vmem (!%p248_p13), [#allocation3], %s1026_s25  ;;  %s1027_s27 = sshll.u32 (!%p248_p13), %s1495_s24, 3 }
  0x25   : > { %s930_s3 = scalar_lea.hbm (!%p248_p13), %s1693_s2, %s1178_s28  ;;  %s274_s4 = scalar_lea.vmem (!%p248_p13), [#allocation4], %s1027_s27 }
  0x26   : > { %s932_s5 = sshll.u32 (!%p248_p13), %s274_s4, 4  ;;  %s934_s6 = sshll.u32 (!%p248_p13), %s930_s3, 4  ;;  %s933_s5 = int_to_ptr.vmem [resolvable:$true] %s932_s5  ;;  %s935_s6 = int_to_ptr.hbm [resolvable:$true] %s934_s6 }
  0x27   : > { %s917_s12 = scalar_lea.sflag (!%p248_p13), [#allocation5], %s1495_s24  ;;  %s1248_s7 = sshra.s32 (!%p248_p13), %s935_s6, 4  ;;  %s1249_s7 = int_to_ptr.hbm [resolvable:$true] %s1248_s7 }
  0x28   : > { %v1070_v8 = vld [vmem:[%s1692_s1 + $0x40] sm:$0xf]  ;;  %v1168_v9 = vld [vmem:[%s1692_s1 + $0x4c] sm:$0xf0]  ;;  %v1166_v10 = vld [vmem:[%s1692_s1 + $0x44] sm:$0xf]  ;;  %p1255_p3 = scmp.lt.s32.totalorder %s1249_s7, %s1693_s2 }
  0x29   : > { %v1402_v11 = vor.u32 %v1168_v9, %v1070_v8  ;;  %v1072_v12 = vld [vmem:[%s1692_s1 + $0x50] sm:$0xf0]  ;;  %v1078_v13 = vld [vmem:[%s1692_s1 + $0x48] sm:$0xf]  ;;  %v1169_v14 = vld [vmem:[%s1692_s1 + $0x54] sm:$0xf0] }
  0x2a   : > { %v1413_v15 = vor.u32 %v1166_v10, %v1072_v12  ;;  %v1415_v16 = vor.u32 %v1169_v14, %v1078_v13  ;;  %v1167_v17 = vld [vmem:[%s1692_s1 + $0x4c] sm:$0xf]  ;;  %v1080_v18 = vld [vmem:[%s1692_s1 + $0x58] sm:$0xf0]  ;;  %v1054_v19 = vld [vmem:[%s1692_s1 + $0x20] sm:$0xf] }
  0x2b   : > { %397 = vmatpush.bf16.msra.mxu0 %v1402_v11  ;;  %v1427_v20 = vor.u32 %v1167_v17, %v1080_v18  ;;  %v1164_v21 = vld [vmem:[%s1692_s1 + $0x2c] sm:$0xf0]  ;;  %v1162_v22 = vld [vmem:[%s1692_s1 + $0x24] sm:$0xf]  ;;  %v1056_v23 = vld [vmem:[%s1692_s1 + $0x30] sm:$0xf0] }
  0x2c   : > { %416 = vmatpush.bf16.msra.mxu1 %v1413_v15  ;;  %435 = vmatpush.bf16.msra.mxu2 %v1415_v16  ;;  %v1440_v24 = vor.u32 %v1164_v21, %v1054_v19  ;;  %v1442_v25 = vor.u32 %v1162_v22, %v1056_v23  ;;  %v1062_v26 = vld [vmem:[%s1692_s1 + $0x28] sm:$0xf]  ;;  %v1165_v27 = vld [vmem:[%s1692_s1 + $0x34] sm:$0xf0]  ;;  %v1163_v28 = vld [vmem:[%s1692_s1 + $0x2c] sm:$0xf] }
  0x2d   : > { %454 = vmatpush.bf16.msra.mxu3 %v1427_v20  ;;  %v1454_v29 = vor.u32 %v1165_v27, %v1062_v26  ;;  %v1064_v30 = vld [vmem:[%s1692_s1 + $0x38] sm:$0xf0]  ;;  %v1038_v31 = vld [vmem:[%s1692_s1] sm:$0xf]  ;;  %v1160_v32 = vld [vmem:[%s1692_s1 + $0xc] sm:$0xf0] }
  0x2e   : > { %v1465_v33 = vor.u32 %v1163_v28, %v1064_v30  ;;  %v1158_v34 = vld [vmem:[%s1692_s1 + $0x4] sm:$0xf]  ;;  %v1040_v35 = vld [vmem:[%s1692_s1 + $0x10] sm:$0xf0]  ;;  %v1046_v36 = vld [vmem:[%s1692_s1 + $0x8] sm:$0xf]  ;;  %v1477_v37 = vor.u32 %v1160_v32, %v1038_v31 }
  0x2f   : > { %398 = vmatpush.bf16.msra.mxu0 %v1440_v24  ;;  %v1161_v38 = vld [vmem:[%s1692_s1 + $0x14] sm:$0xf0]  ;;  %v1159_v39 = vld [vmem:[%s1692_s1 + $0xc] sm:$0xf]  ;;  %v1048_v40 = vld [vmem:[%s1692_s1 + $0x18] sm:$0xf0]  ;;  %v1490_v41 = vor.u32 %v1158_v34, %v1040_v35 }
  0x30   : > { %417 = vmatpush.bf16.msra.mxu1 %v1442_v25  ;;  %436 = vmatpush.bf16.msra.mxu2 %v1454_v29  ;;  %v1492_v42 = vor.u32 %v1161_v38, %v1046_v36  ;;  %v1498_v43 = vor.u32 %v1159_v39, %v1048_v40  ;;  %v1030_v44 = vld [vmem:[%s1502_s26] sm:$0xf]  ;;  %v1170_v45 = vld [vmem:[%s1502_s26 + $0xc] sm:$0xf0]  ;;  %vm385_vm0 = vcmask 392192   ;;  %vm894_vm1 = vcmask 1043456  }
  0x31   : > { %455 = vmatpush.bf16.msra.mxu3 %v1465_v33  ;;  %v1031_v46 = vor.u32 %v1170_v45, %v1030_v44  ;;  %v1034_v47 = vld [vmem:[%s1502_s26 + $0x20] sm:$0xf]  ;;  %v1171_v48 = vld [vmem:[%s1502_s26 + $0x2c] sm:$0xf0]  ;;  %v1098_v50 = vld [vmem:[%s1502_s26 + $0x4] sm:$0xf] }
  0x32   : > { %v1035_v49 = vor.u32 %v1171_v48, %v1034_v47  ;;  %v1172_v51 = vld [vmem:[%s1502_s26 + $0x10] sm:$0xf0]  ;;  %v1102_v53 = vld [vmem:[%s1502_s26 + $0x24] sm:$0xf]  ;;  %v1118_v56 = vld [vmem:[%s1502_s26 + $0x8] sm:$0xf] }
  0x33   : > { %399 = vmatpush.bf16.msra.mxu0 %v1477_v37  ;;  %v1099_v52 = vor.u32 %v1172_v51, %v1098_v50  ;;  %v1173_v54 = vld [vmem:[%s1502_s26 + $0x30] sm:$0xf0]  ;;  %v1174_v57 = vld [vmem:[%s1502_s26 + $0x14] sm:$0xf0]  ;;  %v1122_v59 = vld [vmem:[%s1502_s26 + $0x28] sm:$0xf] }
  0x34   : > { %418 = vmatpush.bf16.msra.mxu1 %v1490_v41  ;;  %437 = vmatpush.bf16.msra.mxu2 %v1492_v42  ;;  %v1103_v55 = vor.u32 %v1173_v54, %v1102_v53  ;;  %v1119_v58 = vor.u32 %v1174_v57, %v1118_v56  ;;  %v1175_v60 = vld [vmem:[%s1502_s26 + $0x34] sm:$0xf0]  ;;  %v1138_v62 = vld [vmem:[%s1502_s26 + $0xc] sm:$0xf]  ;;  %v1176_v63 = vld [vmem:[%s1502_s26 + $0x18] sm:$0xf0] }
  0x35   : > { %456 = vmatpush.bf16.msra.mxu3 %v1498_v43  ;;  %v1123_v61 = vor.u32 %v1175_v60, %v1122_v59  ;;  %v1139_v0 = vor.u32 %v1176_v63, %v1138_v62  ;;  %v1142_v1 = vld [vmem:[%s1502_s26 + $0x2c] sm:$0xf]  ;;  %v1177_v2 = vld [vmem:[%s1502_s26 + $0x38] sm:$0xf0]  ;;  %vm900_vm2 = vcmask 1041409   ;;  %vm902_vm3 = vcmask 1045509  }
  0x36   : > { %1084 = vmatmul.msk.bf16.vlgmr.msra.gmra.mxu0 %vm385_vm0, %v1031_v46  ;;  %v1143_v3 = vor.u32 %v1177_v2, %v1142_v1  ;;  %vm905_vm4 = vcmask 1042434   ;;  %vm907_vm5 = vcmask 1046534   ;;  %vm910_vm6 = vcmask 1043459   ;;  %s1250_s8 = scalar_lea.hbm %s1249_s7, 8  ;;  %s1254_s18 = scalar_lea.hbm %s1693_s2, 16 }
  0x37   : > { %1086 = vmatmul.msk.bf16.vlgmr.msra.gmra.mxu1 %vm385_vm0, %v1031_v46  ;;  %1088 = vmatmul.msk.bf16.vlgmr.msra.gmra.mxu2 %vm385_vm0, %v1031_v46  ;;  %vm912_vm7 = vcmask 1047559   ;;  %p1251_p0 = scmp.ne.s32.totalorder %s1249_s7, %s1250_s8  ;;  %p1256_p4 = scmp.lt.s32.totalorder %s1254_s18, %s1250_s8 }
  0x38   : > { %548 = vmatpush.bf16.msrb.mxu2 %v1415_v16  ;;  %1090 = vmatmul.msk.bf16.vlgmr.msra.gmra.mxu3 %vm385_vm0, %v1031_v46 }
  0x39   : > { %567 = vmatpush.bf16.msrb.mxu3 %v1427_v20  ;;  %529 = vmatpush.bf16.msrb.mxu1 %v1413_v15  ;;  %p1252_p1 = pnand %p1251_p0, %p1368_p5  ;;  %p1257_p6 = por %p1256_p4, %p1255_p3 }
  0x3a   : > { %510 = vmatpush.bf16.msrb.mxu0 %v1402_v11 }
  0x3b   : > { %p1253_p2 = pneg %p1252_p1 }
  0x3c   : > { %549 = vmatpush.bf16.msrb.mxu2 %v1454_v29 }
  0x3d   : > { %568 = vmatpush.bf16.msrb.mxu3 %v1465_v33  ;;  %530 = vmatpush.bf16.msrb.mxu1 %v1442_v25  ;;  %p1258_p7 = pnand %p1257_p6, %p1253_p2 }
  0x3e   : > { %511 = vmatpush.bf16.msrb.mxu0 %v1440_v24 }
  0x40   : > { %550 = vmatpush.bf16.msrb.mxu2 %v1492_v42 }
  0x41   : > { %569 = vmatpush.bf16.msrb.mxu3 %v1498_v43  ;;  %531 = vmatpush.bf16.msrb.mxu1 %v1490_v41 }
  0x42   : > { %512 = vmatpush.bf16.msrb.mxu0 %v1477_v37 }
  0x44   : > { %661 = vmatpush.bf16.msra.mxu2 %v1415_v16 }
  0x45   : > { %680 = vmatpush.bf16.msra.mxu3 %v1427_v20  ;;  %642 = vmatpush.bf16.msra.mxu1 %v1413_v15 }
  0x46   : > { %623 = vmatpush.bf16.msra.mxu0 %v1402_v11 }
  0x47   : > { %1085 = vmatmul.msk.bf16.gmra.mxu0 %vm385_vm0, %v1035_v49  ;;  %1087 = vmatmul.msk.bf16.gmra.mxu1 %vm385_vm0, %v1035_v49 }
  0x48   : > { %662 = vmatpush.bf16.msra.mxu2 %v1454_v29  ;;  %1091 = vmatmul.msk.bf16.gmra.mxu3 %vm385_vm0, %v1035_v49 }
  0x49   : > { %681 = vmatpush.bf16.msra.mxu3 %v1465_v33  ;;  %643 = vmatpush.bf16.msra.mxu1 %v1442_v25 }
  0x4a   : > { %1089 = vmatmul.msk.bf16.gmra.mxu2 %vm385_vm0, %v1035_v49  ;;  %624 = vmatpush.bf16.msra.mxu0 %v1440_v24 }
  0x4c   : > { %663 = vmatpush.bf16.msra.mxu2 %v1492_v42 }
  0x4d   : > { %682 = vmatpush.bf16.msra.mxu3 %v1498_v43  ;;  %644 = vmatpush.bf16.msra.mxu1 %v1490_v41 }
  0x4e   : > { %625 = vmatpush.bf16.msra.mxu0 %v1477_v37 }
  0x57   : > { %1104 = vmatmul.msk.bf16.vlgmr.msrb.gmra.mxu0 %vm385_vm0, %v1099_v52  ;;  %1106 = vmatmul.msk.bf16.vlgmr.msrb.gmra.mxu1 %vm385_vm0, %v1099_v52 }
  0x58   : > { %1110 = vmatmul.msk.bf16.vlgmr.msrb.gmra.mxu3 %vm385_vm0, %v1099_v52  ;;  %755 = vmatpush.bf16.msrb.mxu1 %v1413_v15 }
  0x59   : > { %793 = vmatpush.bf16.msrb.mxu3 %v1427_v20  ;;  %736 = vmatpush.bf16.msrb.mxu0 %v1402_v11 }
  0x5a   : > { %1108 = vmatmul.msk.bf16.vlgmr.msrb.gmra.mxu2 %vm385_vm0, %v1099_v52 }
  0x5b   : > { %774 = vmatpush.bf16.msrb.mxu2 %v1415_v16 }
  0x5c   : > { %756 = vmatpush.bf16.msrb.mxu1 %v1442_v25 }
  0x5d   : > { %794 = vmatpush.bf16.msrb.mxu3 %v1465_v33  ;;  %737 = vmatpush.bf16.msrb.mxu0 %v1440_v24 }
  0x5f   : > { %775 = vmatpush.bf16.msrb.mxu2 %v1454_v29 }
  0x60   : > { %757 = vmatpush.bf16.msrb.mxu1 %v1490_v41 }
  0x61   : > { %795 = vmatpush.bf16.msrb.mxu3 %v1498_v43  ;;  %738 = vmatpush.bf16.msrb.mxu0 %v1477_v37 }
  0x63   : > { %776 = vmatpush.bf16.msrb.mxu2 %v1492_v42 }
  0x67   : > { %1105 = vmatmul.msk.bf16.gmra.mxu0 %vm385_vm0, %v1103_v55  ;;  %1107 = vmatmul.msk.bf16.gmra.mxu1 %vm385_vm0, %v1103_v55 }
  0x68   : > { %1111 = vmatmul.msk.bf16.gmra.mxu3 %vm385_vm0, %v1103_v55 }
  0x6a   : > { %1109 = vmatmul.msk.bf16.gmra.mxu2 %vm385_vm0, %v1103_v55 }
  0x77   : > { %1124 = vmatmul.msk.bf16.vlgmr.msra.gmra.mxu0 %vm385_vm0, %v1119_v58  ;;  %1126 = vmatmul.msk.bf16.vlgmr.msra.gmra.mxu1 %vm385_vm0, %v1119_v58 }
  0x78   : > { %1130 = vmatmul.msk.bf16.vlgmr.msra.gmra.mxu3 %vm385_vm0, %v1119_v58 }
  0x7a   : > { %1128 = vmatmul.msk.bf16.vlgmr.msra.gmra.mxu2 %vm385_vm0, %v1119_v58 }
  0x87   : > { %1125 = vmatmul.msk.bf16.gmra.mxu0 %vm385_vm0, %v1123_v61  ;;  %1127 = vmatmul.msk.bf16.gmra.mxu1 %vm385_vm0, %v1123_v61 }
  0x88   : > { %1131 = vmatmul.msk.bf16.gmra.mxu3 %vm385_vm0, %v1123_v61 }
  0x8a   : > { %1129 = vmatmul.msk.bf16.gmra.mxu2 %vm385_vm0, %v1123_v61 }
  0x97   : > { %1144 = vmatmul.msk.bf16.vlgmr.msrb.gmra.mxu0 %vm385_vm0, %v1139_v0  ;;  %1146 = vmatmul.msk.bf16.vlgmr.msrb.gmra.mxu1 %vm385_vm0, %v1139_v0 }
  0x98   : > { %1150 = vmatmul.msk.bf16.vlgmr.msrb.gmra.mxu3 %vm385_vm0, %v1139_v0 }
  0x9a   : > { %1148 = vmatmul.msk.bf16.vlgmr.msrb.gmra.mxu2 %vm385_vm0, %v1139_v0 }
  0xa7   : > { %1145 = vmatmul.msk.bf16.gmra.mxu0 %vm385_vm0, %v1143_v3  ;;  %1147 = vmatmul.msk.bf16.gmra.mxu1 %vm385_vm0, %v1143_v3 }
  0xa8   : > { %1151 = vmatmul.msk.bf16.gmra.mxu3 %vm385_vm0, %v1143_v3 }
  0xaa   : > { %1149 = vmatmul.msk.bf16.gmra.mxu2 %vm385_vm0, %v1143_v3 }
  0xb3   : > { %v401_v4 = vpop.f32.mrf.mxu0 }
  0xb4   : > { %v420_v5 = vpop.f32.mrf.mxu1 }
  0xba   : > { %v439_v6 = vpop.f32.mrf.mxu2 }
  0xbb   : > { %v1591_v7 = vmul.f32 %v439_v6, %v401_v4  ;;  %v458_v8 = vpop.f32.mrf.mxu3  ;;  %v403_v9 = vpop.f32.mrf.mxu0 }
  0xbc   : > { %v1593_v10 = vmul.f32 %v458_v8, %v420_v5  ;;  %v422_v11 = vpop.f32.mrf.mxu1 }
  0xc2   : > { %v441_v12 = vpop.f32.mrf.mxu2 }
  0xc3   : > { %v1595_v13 = vmul.f32 %v441_v12, %v403_v9  ;;  %v460_v14 = vpop.f32.mrf.mxu3 }
  0xc4   : > { %v406_v15 = vpop.f32.mrf.mxu0  ;;  %v1597_v16 = vmul.f32 %v460_v14, %v422_v11  ;;  %v425_v17 = vpop.f32.mrf.mxu1 }
  0xcb   : > { %v463_v20 = vpop.f32.mrf.mxu3 }
  0xcc   : > { %v408_v21 = vpop.f32.mrf.mxu0  ;;  %v1601_v22 = vmul.f32 %v463_v20, %v425_v17  ;;  %v427_v23 = vpop.f32.mrf.mxu1 }
  0xcd   : > { %v444_v18 = vpop.f32.mrf.mxu2 }
  0xce   : > { %v1599_v19 = vmul.f32 %v444_v18, %v406_v15 }
  0xd3   : > { %v465_v26 = vpop.f32.mrf.mxu3 }
  0xd4   : > { %v514_v27 = vpop.f32.mrf.mxu0  ;;  %v1605_v28 = vmul.f32 %v465_v26, %v427_v23  ;;  %v533_v29 = vpop.f32.mrf.mxu1 }
  0xd5   : > { %v446_v24 = vpop.f32.mrf.mxu2 }
  0xd6   : > { %v1603_v25 = vmul.f32 %v446_v24, %v408_v21 }
  0xdb   : > { %v571_v32 = vpop.f32.mrf.mxu3 }
  0xdc   : > { %v516_v33 = vpop.f32.mrf.mxu0  ;;  %v582_v34 = vmul.f32 %v571_v32, %v533_v29  ;;  %v535_v35 = vpop.f32.mrf.mxu1 }
  0xdd   : > { %v552_v30 = vpop.f32.mrf.mxu2 }
  0xde   : > { %v581_v31 = vmul.f32 %v552_v30, %v514_v27  ;;  %v590_v37 = vmax.f32 %v1593_v10, %v582_v34 }
  0xe0   : > { %v589_v36 = vmax.f32 %v1591_v7, %v581_v31 }
  0xe3   : > { %v573_v40 = vpop.f32.mrf.mxu3 }
  0xe4   : > { %v519_v41 = vpop.f32.mrf.mxu0  ;;  %v584_v42 = vmul.f32 %v573_v40, %v535_v35  ;;  %v538_v43 = vpop.f32.mrf.mxu1 }
  0xe5   : > { %v554_v38 = vpop.f32.mrf.mxu2 }
  0xe6   : > { %v583_v39 = vmul.f32 %v554_v38, %v516_v33  ;;  %v592_v45 = vmax.f32 %v1597_v16, %v584_v42 }
  0xe8   : > { %v591_v44 = vmax.f32 %v1595_v13, %v583_v39 }
  0xeb   : > { %v576_v48 = vpop.f32.mrf.mxu3 }
  0xec   : > { %v1613_v49 = vpop.f32.mrf.mxu0  ;;  %v1615_v50 = vmul.f32 %v576_v48, %v538_v43  ;;  %v1617_v51 = vpop.f32.mrf.mxu1 }
  0xed   : > { %v557_v46 = vpop.f32.mrf.mxu2 }
  0xee   : > { %v1611_v47 = vmul.f32 %v557_v46, %v519_v41  ;;  %v594_v53 = vmax.f32 %v1601_v22, %v1615_v50 }
  0xf0   : > { %v593_v52 = vmax.f32 %v1599_v19, %v1611_v47 }
  0xf3   : > { %v1625_v55 = vpop.f32.mrf.mxu3 }
  0xf4   : > { %v627_v56 = vpop.f32.mrf.mxu0  ;;  %v646_v57 = vpop.f32.mrf.mxu1 }
  0xf5   : > { %v1623_v54 = vpop.f32.mrf.mxu2 }
  0xfb   : > { %v684_v59 = vpop.f32.mrf.mxu3 }
  0xfc   : > { %v629_v60 = vpop.f32.mrf.mxu0  ;;  %v648_v61 = vpop.f32.mrf.mxu1  ;;  %v695_v11 = vmul.f32 %v684_v59, %v646_v57 }
  0xfd   : > { %v665_v58 = vpop.f32.mrf.mxu2 }
  0xfe   : > { %v694_v10 = vmul.f32 %v665_v58, %v627_v56  ;;  %v703_v16 = vmax.f32 %v590_v37, %v695_v11  ;;  %v587_v11 = vmul.f32 %v1623_v54, %v1613_v49 }
 0x100   : > { %v702_v13 = vmax.f32 %v589_v36, %v694_v10  ;;  %v595_v49 = vmax.f32 %v1603_v25, %v587_v11 }
 0x103   : > { %v686_v63 = vpop.f32.mrf.mxu3 }
 0x104   : > { %v632_v0 = vpop.f32.mrf.mxu0  ;;  %v651_v1 = vpop.f32.mrf.mxu1  ;;  %v697_v26 = vmul.f32 %v686_v63, %v648_v61 }
 0x105   : > { %v667_v62 = vpop.f32.mrf.mxu2 }
 0x106   : > { %v696_v21 = vmul.f32 %v667_v62, %v629_v60  ;;  %v705_v36 = vmax.f32 %v592_v45, %v697_v26 }
 0x108   : > { %v704_v32 = vmax.f32 %v591_v44, %v696_v21 }
 0x10b   : > { %v689_v3 = vpop.f32.mrf.mxu3 }
 0x10c   : > { %v1627_v4 = vpop.f32.mrf.mxu0  ;;  %v1629_v5 = vpop.f32.mrf.mxu1  ;;  %v699_v46 = vmul.f32 %v689_v3, %v651_v1 }
 0x10d   : > { %v670_v2 = vpop.f32.mrf.mxu2 }
 0x10e   : > { %v698_v41 = vmul.f32 %v670_v2, %v632_v0  ;;  %v707_v45 = vmax.f32 %v594_v53, %v699_v46 }
 0x110   : > { %v706_v44 = vmax.f32 %v593_v52, %v698_v41  ;;  %v588_v52 = vmul.f32 %v1625_v55, %v1617_v51 }
 0x112   : > { %v596_v51 = vmax.f32 %v1605_v28, %v588_v52 }
 0x113   : > { %v1633_v7 = vpop.f32.mrf.mxu3 }
 0x114   : > { %v740_v8 = vpop.f32.mrf.mxu0  ;;  %v759_v9 = vpop.f32.mrf.mxu1  ;;  %v701_v53 = vmul.f32 %v1633_v7, %v1629_v5 }
 0x115   : > { %v1631_v6 = vpop.f32.mrf.mxu2 }
 0x116   : > { %v700_v50 = vmul.f32 %v1631_v6, %v1627_v4  ;;  %v709_v26 = vmax.f32 %v596_v51, %v701_v53 }
 0x11b   : > { %v797_v15 = vpop.f32.mrf.mxu3 }
 0x11c   : > { %v808_v17 = vmul.f32 %v797_v15, %v759_v9  ;;  %v742_v20 = vpop.f32.mrf.mxu0  ;;  %v761_v24 = vpop.f32.mrf.mxu1 }
 0x11d   : > { %v778_v12 = vpop.f32.mrf.mxu2 }
 0x11e   : > { %v807_v14 = vmul.f32 %v778_v12, %v740_v8  ;;  %v816_v19 = vmax.f32 %v703_v16, %v808_v17 }
 0x120   : > { %v815_v18 = vmax.f32 %v702_v13, %v807_v14  ;;  %v840_v27 = vrot.slane %v816_v19, 4 }
 0x122   : > { %v834_v23 = vrot.slane %v815_v18, 4  ;;  %v841_v30 = vmax.f32 %v816_v19, %v840_v27 }
 0x123   : > { %v799_v35 = vpop.f32.mrf.mxu3 }
 0x124   : > { %v835_v29 = vmax.f32 %v815_v18, %v834_v23  ;;  %v842_v38 = vrot.slane %v841_v30, 2  ;;  %v810_v39 = vmul.f32 %v799_v35, %v761_v24  ;;  %v745_v58 = vpop.f32.mrf.mxu0  ;;  %v764_v60 = vpop.f32.mrf.mxu1  ;;  %v708_v24 = vmax.f32 %v595_v49, %v700_v50 }
 0x125   : > { %v780_v31 = vpop.f32.mrf.mxu2 }
 0x126   : > { %v836_v33 = vrot.slane %v835_v29, 2  ;;  %v809_v34 = vmul.f32 %v780_v31, %v742_v20  ;;  %v843_v42 = vmax.f32 %v841_v30, %v842_v38  ;;  %v818_v43 = vmax.f32 %v705_v36, %v810_v39 }
 0x128   : > { %v837_v37 = vmax.f32 %v835_v29, %v836_v33  ;;  %v817_v40 = vmax.f32 %v704_v32, %v809_v34  ;;  %v844_v56 = vrot.slane %v843_v42, 1  ;;  %v852_v57 = vrot.slane %v818_v43, 4 }
 0x12a   : > { %v846_v47 = vrot.slane %v817_v40, 4  ;;  %v838_v48 = vrot.slane %v837_v37, 1  ;;  %v845_v61 = vmax.f32 %v843_v42, %v844_v56  ;;  %v853_v62 = vmax.f32 %v818_v43, %v852_v57 }
 0x12b   : > { %v802_v2 = vpop.f32.mrf.mxu3 }
 0x12c   : > { %v847_v59 = vmax.f32 %v817_v40, %v846_v47  ;;  %v839_v1 = vmax.f32 %v837_v37, %v838_v48  ;;  %v890_v3 = vrot.slane %v845_v61, 4  ;;  %v854_v9 = vrot.slane %v853_v62, 2  ;;  %v747_v21 = vpop.f32.mrf.mxu0  ;;  %v766_v4 = vpop.f32.mrf.mxu1 }
 0x12d   : > { %v783_v63 = vpop.f32.mrf.mxu2  ;;  %v812_v10 = vmul.f32 %v802_v2, %v764_v60 }
 0x12e   : > { %v848_v8 = vrot.slane %v847_v59, 2  ;;  %v811_v0 = vmul.f32 %v783_v63, %v745_v58  ;;  %v855_v14 = vmax.f32 %v853_v62, %v854_v9  ;;  %v895_v22 = vsel %vm894_vm1, %v839_v1, %v890_v3 }
 0x12f   : > { %v820_v15 = vmax.f32 %v707_v45, %v812_v10 }
 0x130   : > { %v849_v12 = vmax.f32 %v847_v59, %v848_v8  ;;  %v819_v13 = vmax.f32 %v706_v44, %v811_v0  ;;  %v856_v18 = vrot.slane %v855_v14, 1 }
 0x131   : > { %v864_v19 = vrot.slane %v820_v15, 4 }
 0x132   : > { %v858_v16 = vrot.slane %v819_v13, 4  ;;  %v850_v17 = vrot.slane %v849_v12, 1  ;;  %v857_v55 = vmax.f32 %v855_v14, %v856_v18 }
 0x133   : > { %v865_v20 = vmax.f32 %v820_v15, %v864_v19  ;;  %v804_v29 = vpop.f32.mrf.mxu3 }
 0x134   : > { %v859_v54 = vmax.f32 %v819_v13, %v858_v16  ;;  %v851_v5 = vmax.f32 %v849_v12, %v850_v17  ;;  %v891_v7 = vrot.slane %v857_v55, 4  ;;  %v814_v31 = vmul.f32 %v804_v29, %v766_v4 }
 0x135   : > { %v785_v23 = vpop.f32.mrf.mxu2  ;;  %v866_v30 = vrot.slane %v865_v20, 2 }
 0x136   : > { %v860_v27 = vrot.slane %v859_v54, 2  ;;  %v813_v6 = vmul.f32 %v785_v23, %v747_v21  ;;  %v822_v34 = vmax.f32 %v709_v26, %v814_v31  ;;  %v896_v28 = vsel %vm894_vm1, %v851_v5, %v891_v7 }
 0x137   : > { %v867_v25 = vmax.f32 %v865_v20, %v866_v30  ;;  %v899_v36 = vrot.slane %v896_v28, 7 }
 0x138   : > { %v861_v32 = vmax.f32 %v859_v54, %v860_v27  ;;  %v821_v33 = vmax.f32 %v708_v24, %v813_v6  ;;  %v876_v37 = vrot.slane %v822_v34, 4 }
 0x139   : > { %v868_v39 = vrot.slane %v867_v25, 1  ;;  %v901_v41 = vsel %vm900_vm2, %v899_v36, %v895_v22 }
 0x13a   : > { %v870_v35 = vrot.slane %v821_v33, 4  ;;  %v862_v38 = vrot.slane %v861_v32, 1  ;;  %v877_v43 = vmax.f32 %v822_v34, %v876_v37  ;;  %v903_v46 = vsel %vm902_vm3, %v899_v36, %v901_v41 }
 0x13b   : > { %v869_v42 = vmax.f32 %v867_v25, %v868_v39 }
 0x13c   : > { %v871_v40 = vmax.f32 %v821_v33, %v870_v35  ;;  %v863_v48 = vmax.f32 %v861_v32, %v862_v38  ;;  %v878_v57 = vrot.slane %v877_v43, 2 }
 0x13d   : > { %v892_v56 = vrot.slane %v869_v42, 4 }
 0x13e   : > { %v872_v47 = vrot.slane %v871_v40, 2  ;;  %v879_v59 = vmax.f32 %v877_v43, %v878_v57 }
 0x13f   : > { %v897_v60 = vsel %vm894_vm1, %v863_v48, %v892_v56 }
 0x140   : > { %v873_v58 = vmax.f32 %v871_v40, %v872_v47  ;;  %v904_v44 = vrot.slane %v897_v60, 6  ;;  %v880_v62 = vrot.slane %v879_v59, 1 }
 0x142   : > { %v874_v61 = vrot.slane %v873_v58, 1  ;;  %v906_v63 = vsel %vm905_vm4, %v904_v44, %v903_v46  ;;  %v881_v45 = vmax.f32 %v879_v59, %v880_v62 }
 0x143   : > { %v908_v8 = vsel %vm907_vm5, %v904_v44, %v906_v63 }
 0x144   : > { %v875_v0 = vmax.f32 %v873_v58, %v874_v61  ;;  %v893_v2 = vrot.slane %v881_v45, 4 }
 0x146   : > { %v898_v1 = vsel %vm894_vm1, %v875_v0, %v893_v2 }
 0x147   : > { %v909_v3 = vrot.slane %v898_v1, 5 }
 0x149   : > { %v911_v9 = vsel %vm910_vm6, %v909_v3, %v908_v8 }
 0x14a   : > { %v913_v10 = vsel %vm912_vm7, %v909_v3, %v911_v9 }
 0x14b   : > { %915 = vst [vmem:[%s274_s4] sm:$0xff] %v913_v10 }
 0x14c   : > { %1261 = shalt.err (!%p1258_p7)
}
 0x14d   : > { %1179 = dma.vmem_to_hbm [thread:$0]  (%p1368_p5), %s933_s5, 128, %s935_s6, %s917_s12  }
 0x14e PF: > { %s946_s24 = sand.u32 1, %s1292_s9   ;;  %p1182_p8 = pnand %p1021_p10, %p1379_p9 }
 0x14f   : > { %s947_s25 = scalar_lea.sflag [#allocation5], %s946_s24 }
 0x150   : > { %p1183_p11 = pneg %p1182_p8 }
 0x152   : > { %1287 = dma.done.wait (%p1183_p11), %s947_s25, 128  }
 0x153   : > { %1289 = vsyncadd (%p1183_p11), %s947_s25, 4294967168  ;;  %s15_s14 = sadd.s32 1, %s1312_s14   ;;  %s1696_s9 = smov %s1296_s10 }
 0x154   : > { %p12_p12 = scmp.ge.s32.totalorder %s15_s14, 4   ;;  %s1697_s10 = smov %s1300_s11 }
 0x155   : > { %s1698_s11 = smov %s1377_s21  ;;  %s1699_s12 = smov %s1308_s13 }
 0x156   : > { %s1700_s13 = smov %s1702_s17  ;;  %14 = sbr.rel (!%p12_p12) target bundleno = 4 (0x4), region = 120 }
 0x15b   :  { %953 = vsyncpa [#allocation5], 1 }
 0x15c   :  { %955 = vsyncpa [#allocation5 + $0x1], 1 }

</bundles_post_ra>
